<compile_context>
chip_gen: v5e
topology: v5e:2x2
jax: 0.10.0
libtpu: 0.0.40
codegen_flags: <defaults>
</compile_context>

<pallas_src>
import functools

import jax
import jax.numpy as jnp
import numpy as np
from jax.experimental import pallas as pl
from jax.experimental.pallas import tpu as pltpu


def _round_up(x, m):
    return pl.cdiv(x, m) * m


def _att_pool_kernel(x_ref, wfc_ref, wconv_ref, bconv_ref, y_ref, *, num_k, d_in):
    # x_ref: (tile_n, K*D) in storage dtype; lane-dense (neighbor blocks of D
    # channels concatenated along the lane axis).
    x_in = x_ref[...]

    # fc: a single lane-dense MXU matmul against block-diag(w_fc^T), f32 acc.
    att = jnp.dot(x_in, wfc_ref[...], preferred_element_type=jnp.float32)

    # Elementwise math in f32: exact across generations and avoids emulated
    # bf16 VPU/EUP on v5e.  The MXU already consumed x_in in storage dtype.
    x = x_in.astype(jnp.float32)

    # Softmax over the K neighbor blocks (each D lanes wide) via a circular
    # roll butterfly: log2(K) XLU rotations keep every op at 128-lane density.
    n_steps = num_k.bit_length() - 1          # K is a power of two (asserted)
    m = att
    for j in range(n_steps):
        m = jnp.maximum(m, pltpu.roll(m, shift=d_in << j, axis=1))
    e = jnp.exp(att - m)                      # EUP
    num = x * e
    den = e
    for j in range(n_steps):
        s = d_in << j
        num = num + pltpu.roll(num, shift=s, axis=1)
        den = den + pltpu.roll(den, shift=s, axis=1)

    # After the full tree every D-lane block holds the complete K-reduction;
    # take block 0.
    num0 = num[:, :d_in]
    den0 = den[:, :d_in]

    # Divide on the EUP (vrcp) + one Newton step on the VPU to recover full
    # f32 accuracy (keeps the 1e-4 tolerance vs. the f32 reference).
    inv = pl.reciprocal(den0, approx=True)
    inv = inv * (2.0 - den0 * inv)
    agg = num0 * inv                          # (tile_n, D) f32

    # SharedMLP 1x1 Conv2d == dense matmul; d_out is zero-padded to 128 lanes
    # in the wrapper so the store is a full, unmasked lane-dense vst.
    # TODO(synk): emit bf16 output (or masked narrow stores) to trim the 8x
    # padded writeback if it ever shows up on the HBM roofline.
    y = jnp.dot(agg, wconv_ref[...], preferred_element_type=jnp.float32)
    y_ref[...] = (y + bconv_ref[...]).astype(y_ref.dtype)


def att_pooling(feature_set, w_fc, w_conv, b_conv, gamma, beta, *,
                tile_n=512, eps=1e-6, storage_dtype=jnp.float32):
    """feature_set: (N, K, d_in) f32.  Returns (N, d_out) f32."""
    N, K, D = feature_set.shape
    d_out = w_conv.shape[0]

    # Lane-dense path requirements (hold for RandLA-Net shapes: K=16, d_in=32).
    assert K >= 2 and (K & (K - 1)) == 0, "roll-tree softmax needs power-of-two K"
    assert (K * D) % 128 == 0, "lane-dense layout needs K*d_in % 128 == 0"
    # TODO(synk): generalize to other K (pad K + mask e before the reductions).

    d_pad = int(_round_up(d_out, 128))            # lane-dense output width

    # Tile over N: multiple of 8 sublanes; N padded to whole tiles.
    tile_n = max(8, min(int(tile_n), int(_round_up(N, 8))))
    tile_n = int(_round_up(tile_n, 8))
    n_pad = int(_round_up(N, tile_n))

    # Lane-dense activation layout: (N, K, D) -> (N, K*D).  Row-major
    # contiguous, so this reshape is free in the wrapper.
    x = jnp.asarray(feature_set, jnp.float32).reshape(N, K * D)
    if n_pad != N:
        x = jnp.pad(x, ((0, n_pad - N), (0, 0)))
    x = x.astype(storage_dtype)

    # fc weight: pre-transpose and replicate onto a (K*D, K*D) block diagonal
    # once, so the kernel issues ONE lane-dense MXU matmul.  Adding zeros is
    # exact, so this matches the per-neighbor Linear bit-for-bit.
    wfc_t = jnp.asarray(w_fc, jnp.float32).T                       # (D, D)
    wfc_bd = jnp.kron(jnp.eye(K, dtype=jnp.float32), wfc_t).astype(storage_dtype)

    # Conv weight / bias stay f32 (tiny) so the final matmul + bias are exact.
    wconv_t = jnp.zeros((D, d_pad), jnp.float32).at[:, :d_out].set(
        jnp.asarray(w_conv, jnp.float32).T)                        # (D, d_pad)
    bconv_p = jnp.zeros((1, d_pad), jnp.float32).at[:, :d_out].set(
        jnp.asarray(b_conv, jnp.float32))                          # (1, d_pad)

    kernel = functools.partial(_att_pool_kernel, num_k=K, d_in=D)

    y_pad = pl.pallas_call(
        kernel,
        out_shape=jax.ShapeDtypeStruct((n_pad, d_pad), jnp.float32),
        grid=(n_pad // tile_n,),
        in_specs=[
            pl.BlockSpec((tile_n, K * D), lambda i: (i, 0)),   # x tile
            pl.BlockSpec((K * D, K * D), lambda i: (0, 0)),    # block-diag fc^T
            pl.BlockSpec((D, d_pad), lambda i: (0, 0)),        # conv weight^T
            pl.BlockSpec((1, d_pad), lambda i: (0, 0)),        # conv bias
        ],
        out_specs=pl.BlockSpec((tile_n, d_pad), lambda i: (i, 0)),
        compiler_params=pltpu.CompilerParams(
            dimension_semantics=("parallel",),   # independent tiles; 2 TCs on v7x
            vmem_limit_bytes=40 * 1024 * 1024,   # ~12 MiB live at tile_n=512 f32
        ),
    )(x, wfc_bd, wconv_t, bconv_p)

    y = y_pad[:N, :d_out]

    # SharedMLP BatchNorm2d(eps=1e-6), training-mode batch statistics over N
    # (biased variance), affine, then ReLU.  Global-over-N stats cannot live
    # inside the N-tiled kernel body; this (N, d_out) epilogue is negligible.
    # TODO(synk): for very large N, emit per-tile sum / sum-of-squares from the
    # kernel so this epilogue does not re-read y from HBM.
    mu = jnp.mean(y, axis=0, keepdims=True)
    var = jnp.mean(jnp.square(y - mu), axis=0, keepdims=True)
    yn = (y - mu) * jax.lax.rsqrt(var + eps) * gamma + beta
    return jnp.maximum(yn, 0.0)


def _reference(feature_set, w_fc, w_conv, b_conv, gamma, beta, eps=1e-6):
    att = jnp.einsum('nkd,ed->nke', feature_set, w_fc)
    scores = jax.nn.softmax(att, axis=1)
    agg = jnp.sum(feature_set * scores, axis=1)
    y = agg @ w_conv.T + b_conv
    mu = jnp.mean(y, axis=0, keepdims=True)
    var = jnp.mean((y - mu) ** 2, axis=0, keepdims=True)
    yn = (y - mu) / jnp.sqrt(var + eps) * gamma + beta
    return jnp.maximum(yn, 0.0)


def _make_inputs(key, N, K, d_in, d_out):
    k_x, k_fc, k_cw, k_cb = jax.random.split(key, 4)
    feature_set = jax.random.normal(k_x, (N, K, d_in), dtype=jnp.float32)
    w_fc = jax.random.normal(k_fc, (d_in, d_in), dtype=jnp.float32) / np.sqrt(d_in)
    w_conv = jax.random.normal(k_cw, (d_out, d_in), dtype=jnp.float32) / np.sqrt(d_in)
    b_conv = jax.random.normal(k_cb, (d_out,), dtype=jnp.float32) * 0.1
    gamma = jnp.ones((d_out,), dtype=jnp.float32)   # BatchNorm weight
    beta = jnp.zeros((d_out,), dtype=jnp.float32)   # BatchNorm bias
    return feature_set, w_fc, w_conv, b_conv, gamma, beta


if __name__ == "__main__":
    key_a, key_b = jax.random.split(jax.random.PRNGKey(0))

    # 1) Small single-tile case (shapes consistent with the module's forward).
    args = _make_inputs(key_a, N=8, K=16, d_in=32, d_out=16)
    out = jax.block_until_ready(att_pooling(*args))
    ref = _reference(*args)
    assert out.shape == (8, 16)
    np.testing.assert_allclose(np.asarray(out), np.asarray(ref),
                               atol=1e-4, rtol=1e-4)

    # 2) Multi-tile case exercising N-tiling + remainder padding (grid of 3).
    args2 = _make_inputs(key_b, N=300, K=16, d_in=32, d_out=16)
    out2 = jax.block_until_ready(att_pooling(*args2, tile_n=128))
    ref2 = _reference(*args2)
    assert out2.shape == (300, 16)
    np.testing.assert_allclose(np.asarray(out2), np.asarray(ref2),
                               atol=1e-4, rtol=1e-4)

    # 3) bf16 storage path (halves HBM read traffic on v6e/v7x; elementwise
    #    math stays f32 in-kernel, so it is also correct on v5e).
    out3 = jax.block_until_ready(
        att_pooling(*args2, tile_n=128, storage_dtype=jnp.bfloat16))
    assert out3.shape == (300, 16)
    np.testing.assert_allclose(np.asarray(out3), np.asarray(ref2),
                               atol=5e-2, rtol=5e-2)

    print("KERNEL_OK")
</pallas_src>

<mosaic_0001>
module attributes {stable_mosaic.version = 11 : i64} {
  func.func @_att_pool_kernel(%arg0: i32, %arg1: memref<8x512xf32, #tpu.memory_space<vmem>>, %arg2: memref<512x512xf32, #tpu.memory_space<vmem>>, %arg3: memref<32x128xf32, #tpu.memory_space<vmem>>, %arg4: memref<1x128xf32, #tpu.memory_space<vmem>>, %arg5: memref<8x128xf32, #tpu.memory_space<vmem>>) attributes {dimension_semantics = [#tpu.dimension_semantics<parallel>], iteration_bounds = array<i64: 1>, scalar_prefetch = 0 : i64, scratch_operands = 0 : i64, tpu.core_type = #tpu.core_type<tc>, window_params = [{transform_indices = @transform_0, window_bounds = array<i64: 8, 512>}, {pipeline_mode = #tpu.pipeline_mode<synchronous>, transform_indices = @transform_1, window_bounds = array<i64: 512, 512>}, {pipeline_mode = #tpu.pipeline_mode<synchronous>, transform_indices = @transform_2, window_bounds = array<i64: 32, 128>}, {pipeline_mode = #tpu.pipeline_mode<synchronous>, transform_indices = @transform_3, window_bounds = array<i64: 1, 128>}, {transform_indices = @transform_4, window_bounds = array<i64: 8, 128>}]} {
    %c0 = arith.constant 0 : index
    %c0_0 = arith.constant 0 : index
    %0 = vector.load %arg1[%c0, %c0_0] : memref<8x512xf32, #tpu.memory_space<vmem>>, vector<8x512xf32>
    %c0_1 = arith.constant 0 : index
    %c0_2 = arith.constant 0 : index
    %1 = vector.load %arg2[%c0_1, %c0_2] : memref<512x512xf32, #tpu.memory_space<vmem>>, vector<512x512xf32>
    %cst = arith.constant dense<0.000000e+00> : vector<8x512xf32>
    %2 = tpu.matmul %0, %1, %cst {dimension_numbers = #tpu.dot_dimension_numbers<[1], [0], [0], [1], [0, 0, 1, 1], [], []>} : vector<8x512xf32>, vector<512x512xf32>, vector<8x512xf32> -> vector<8x512xf32>
    %c32_i32 = arith.constant 32 : i32
    %3 = tpu.dynamic_rotate %2 by %c32_i32 dim 1 : vector<8x512xf32>, i32 -> vector<8x512xf32>
    %4 = arith.maximumf %2, %3 : vector<8x512xf32>
    %c64_i32 = arith.constant 64 : i32
    %5 = tpu.dynamic_rotate %4 by %c64_i32 dim 1 : vector<8x512xf32>, i32 -> vector<8x512xf32>
    %6 = arith.maximumf %4, %5 : vector<8x512xf32>
    %c128_i32 = arith.constant 128 : i32
    %7 = tpu.dynamic_rotate %6 by %c128_i32 dim 1 : vector<8x512xf32>, i32 -> vector<8x512xf32>
    %8 = arith.maximumf %6, %7 : vector<8x512xf32>
    %c256_i32 = arith.constant 256 : i32
    %9 = tpu.dynamic_rotate %8 by %c256_i32 dim 1 : vector<8x512xf32>, i32 -> vector<8x512xf32>
    %10 = arith.maximumf %8, %9 : vector<8x512xf32>
    %11 = arith.subf %2, %10 : vector<8x512xf32>
    %12 = math.exp %11 : vector<8x512xf32>
    %13 = arith.mulf %0, %12 : vector<8x512xf32>
    %c32_i32_3 = arith.constant 32 : i32
    %14 = tpu.dynamic_rotate %13 by %c32_i32_3 dim 1 : vector<8x512xf32>, i32 -> vector<8x512xf32>
    %15 = arith.addf %13, %14 : vector<8x512xf32>
    %c32_i32_4 = arith.constant 32 : i32
    %16 = tpu.dynamic_rotate %12 by %c32_i32_4 dim 1 : vector<8x512xf32>, i32 -> vector<8x512xf32>
    %17 = arith.addf %12, %16 : vector<8x512xf32>
    %c64_i32_5 = arith.constant 64 : i32
    %18 = tpu.dynamic_rotate %15 by %c64_i32_5 dim 1 : vector<8x512xf32>, i32 -> vector<8x512xf32>
    %19 = arith.addf %15, %18 : vector<8x512xf32>
    %c64_i32_6 = arith.constant 64 : i32
    %20 = tpu.dynamic_rotate %17 by %c64_i32_6 dim 1 : vector<8x512xf32>, i32 -> vector<8x512xf32>
    %21 = arith.addf %17, %20 : vector<8x512xf32>
    %c128_i32_7 = arith.constant 128 : i32
    %22 = tpu.dynamic_rotate %19 by %c128_i32_7 dim 1 : vector<8x512xf32>, i32 -> vector<8x512xf32>
    %23 = arith.addf %19, %22 : vector<8x512xf32>
    %c128_i32_8 = arith.constant 128 : i32
    %24 = tpu.dynamic_rotate %21 by %c128_i32_8 dim 1 : vector<8x512xf32>, i32 -> vector<8x512xf32>
    %25 = arith.addf %21, %24 : vector<8x512xf32>
    %c256_i32_9 = arith.constant 256 : i32
    %26 = tpu.dynamic_rotate %23 by %c256_i32_9 dim 1 : vector<8x512xf32>, i32 -> vector<8x512xf32>
    %27 = arith.addf %23, %26 : vector<8x512xf32>
    %c256_i32_10 = arith.constant 256 : i32
    %28 = tpu.dynamic_rotate %25 by %c256_i32_10 dim 1 : vector<8x512xf32>, i32 -> vector<8x512xf32>
    %29 = arith.addf %25, %28 : vector<8x512xf32>
    %30 = vector.extract_strided_slice %27 {offsets = [0, 0], sizes = [8, 32], strides = [1, 1]} : vector<8x512xf32> to vector<8x32xf32>
    %31 = vector.extract_strided_slice %29 {offsets = [0, 0], sizes = [8, 32], strides = [1, 1]} : vector<8x512xf32> to vector<8x32xf32>
    %32 = tpu.reciprocal %31 {approx = true} : vector<8x32xf32> -> vector<8x32xf32>
    %33 = arith.mulf %31, %32 : vector<8x32xf32>
    %cst_11 = arith.constant 2.000000e+00 : f32
    %34 = vector.broadcast %cst_11 : f32 to vector<8x32xf32>
    %35 = arith.subf %34, %33 : vector<8x32xf32>
    %36 = arith.mulf %32, %35 : vector<8x32xf32>
    %37 = arith.mulf %30, %36 : vector<8x32xf32>
    %c0_12 = arith.constant 0 : index
    %c0_13 = arith.constant 0 : index
    %38 = vector.load %arg3[%c0_12, %c0_13] : memref<32x128xf32, #tpu.memory_space<vmem>>, vector<32x128xf32>
    %cst_14 = arith.constant dense<0.000000e+00> : vector<8x128xf32>
    %39 = tpu.matmul %37, %38, %cst_14 {dimension_numbers = #tpu.dot_dimension_numbers<[1], [0], [0], [1], [0, 0, 1, 1], [], []>} : vector<8x32xf32>, vector<32x128xf32>, vector<8x128xf32> -> vector<8x128xf32>
    %c0_15 = arith.constant 0 : index
    %c0_16 = arith.constant 0 : index
    %40 = vector.load %arg4[%c0_15, %c0_16] : memref<1x128xf32, #tpu.memory_space<vmem>>, vector<1x128xf32>
    %41 = vector.broadcast %40 : vector<1x128xf32> to vector<8x128xf32>
    %42 = arith.addf %39, %41 : vector<8x128xf32>
    %c0_17 = arith.constant 0 : index
    %c0_18 = arith.constant 0 : index
    %43 = vector.load %arg5[%c0_17, %c0_18] : memref<8x128xf32, #tpu.memory_space<vmem>>, vector<8x128xf32>
    tpu.vector_store %arg5[%c0_17, %c0_18], %42 {strides = array<i32>} : memref<8x128xf32, #tpu.memory_space<vmem>>, vector<8x128xf32>,
    return
  }
  func.func @transform_0(%arg0: i32) -> (i32, i32) {
    %c0_i32 = arith.constant 0 : i32
    %c0_i32_0 = arith.constant 0 : i32
    return %arg0, %c0_i32 : i32, i32
  }
  func.func @transform_1(%arg0: i32) -> (i32, i32) {
    %c0_i32 = arith.constant 0 : i32
    %c0_i32_0 = arith.constant 0 : i32
    %c0_i32_1 = arith.constant 0 : i32
    return %c0_i32, %c0_i32_0 : i32, i32
  }
  func.func @transform_2(%arg0: i32) -> (i32, i32) {
    %c0_i32 = arith.constant 0 : i32
    %c0_i32_0 = arith.constant 0 : i32
    %c0_i32_1 = arith.constant 0 : i32
    return %c0_i32, %c0_i32_0 : i32, i32
  }
  func.func @transform_3(%arg0: i32) -> (i32, i32) {
    %c0_i32 = arith.constant 0 : i32
    %c0_i32_0 = arith.constant 0 : i32
    %c0_i32_1 = arith.constant 0 : i32
    return %c0_i32, %c0_i32_0 : i32, i32
  }
  func.func @transform_4(%arg0: i32) -> (i32, i32) {
    %c0_i32 = arith.constant 0 : i32
    %c0_i32_0 = arith.constant 0 : i32
    return %arg0, %c0_i32 : i32, i32
  }
}

</mosaic_0001>

<bundles_post_ra>
// kernel: tpu_custom_call.1
= control target key start
LH: loop header
LB: loop body
LE: loop exit
PB: predicated region body
PF: predicated region fallthrough
CT: control target
= control target key end

     0   :  { %9 = vsyncpa [#allocation3], 0  ;;  %s1109_s0 = inlined_call_operand.hbm [shape: f32[8,512], index: 0, kind: input, shape index: {}]   ;;  %s1110_s1 = inlined_call_operand.hbm [shape: f32[512,512], index: 1, kind: input, shape index: {}]   ;;  %s1111_s2 = inlined_call_operand.hbm [shape: f32[32,128], index: 2, kind: input, shape index: {}]   ;;  %s1112_s3 = inlined_call_operand.vmem [shape: f32[1,128], index: 3, kind: input, shape index: {}]   ;;  %s1113_s4 = inlined_call_operand.hbm [shape: f32[8,128], index: 4, kind: output, shape index: {}]  }
   0x1   :  { %10 = vsyncpa [#allocation6], 0  ;;  %s27_s17 = sshll.u32 %s1110_s1, 4  ;;  %s28_s17 = int_to_ptr.hbm [resolvable:$true] %s27_s17 }
   0x2   :  { %11 = vsyncpa [#allocation4], 0  ;;  %s950_s18 = smov [#allocation5]   ;;  %s17_s22 = sshll.u32 %s1109_s0, 4  ;;  %s18_s22 = int_to_ptr.hbm [resolvable:$true] %s17_s22 }
   0x3   :  { %s29_s19 = sshll.u32 %s950_s18, 4  ;;  %s951_s23 = smov 512   ;;  %s30_s19 = int_to_ptr.vmem [resolvable:$true] %s29_s19 }
   0x4   :  { %s952_s24 = smov 32   ;;  %s953_s25 = smov [#allocation2]  }
   0x5   :  { %35 = dma.hbm_to_vmem [thread:$0]  %s28_s17, 32768, %s30_s19, [#allocation6], %s951_s23, %s951_s23, %s952_s24  }
   0x6   :  { %s19_s26 = sshll.u32 %s953_s25, 4  ;;  %s40_s1 = sshll.u32 %s1111_s2, 4  ;;  %s20_s26 = int_to_ptr.vmem [resolvable:$true] %s19_s26  ;;  %s41_s1 = int_to_ptr.hbm [resolvable:$true] %s40_s1 }
   0x7   :  { %22 = dma.hbm_to_vmem [thread:$0]  %s18_s22, 512, %s20_s26, [#allocation3]  }
   0x8   :  { %s954_s29 = smov [#allocation7]   ;;  %s955_s5 = smov 128  }
   0x9   :  { %s42_s30 = sshll.u32 %s954_s29, 4  ;;  %s956_s6 = smov 8   ;;  %s43_s30 = int_to_ptr.vmem [resolvable:$true] %s42_s30 }
   0xa   :  { %48 = dma.hbm_to_vmem [thread:$0]  %s41_s1, 512, %s43_s30, [#allocation6], %s955_s5, %s955_s5, %s956_s6  }
   0xb   :  { %944 = dma.done.wait [#allocation3], 512  }
   0xc   :  { %945 = vsyncadd [#allocation3], 4294966784 }
   0xd   :  { %946 = dma.done.wait [#allocation6], 33280  }
   0xe   :  { %947 = vsyncadd [#allocation6], 4294934016  ;;  %v255_v0 = vld [vmem:[#allocation5 + $0x5e0] sm:$0xff]  ;;  %v256_v62 = vld [vmem:[#allocation5 + $0x5e8] sm:$0xff]  ;;  %s957_s0 = smov 64   ;;  %vm784_vm2 = vcmask 261120  }
   0xf   :  { %v251_v1 = vld [vmem:[#allocation5 + $0x5c0] sm:$0xff]  ;;  %363 = vmatpush.msra.mxu2 %v255_v0  ;;  %v320_v63 = vld [vmem:[#allocation5 + $0x7e8] sm:$0xff]  ;;  %s958_s8 = smov [#allocation8]   ;;  %s816_s12 = sshll.u32 %s1113_s4, 4  ;;  %s817_s12 = int_to_ptr.hbm [resolvable:$true] %s816_s12 }
  0x10   :  { %v319_v2 = vld [vmem:[#allocation5 + $0x7e0] sm:$0xff]  ;;  %s814_s9 = sshll.u32 %s958_s8, 4  ;;  %s815_s9 = int_to_ptr.vmem [resolvable:$true] %s814_s9 }
  0x11   :  { %383 = vmatpush.msra.mxu3 %v319_v2  ;;  %v127_v3 = vld [vmem:[#allocation5 + $0x1e0] sm:$0xff]  ;;  %364 = vmatpush.msra.mxu2 %v251_v1  ;;  %v252_v2 = vld [vmem:[#allocation5 + $0x5c8] sm:$0xff] }
  0x12   :  { %v191_v4 = vld [vmem:[#allocation5 + $0x3e0] sm:$0xff]  ;;  %323 = vmatpush.msra.mxu0 %v127_v3  ;;  %v128_v3 = vld [vmem:[#allocation5 + $0x1e8] sm:$0xff] }
  0x13   :  { %v247_v5 = vld [vmem:[#allocation5 + $0x5a0] sm:$0xff]  ;;  %343 = vmatpush.msra.mxu1 %v191_v4  ;;  %v192_v4 = vld [vmem:[#allocation5 + $0x3e8] sm:$0xff] }
  0x14   :  { %v315_v6 = vld [vmem:[#allocation5 + $0x7c0] sm:$0xff]  ;;  %365 = vmatpush.msra.mxu2 %v247_v5  ;;  %v316_v5 = vld [vmem:[#allocation5 + $0x7c8] sm:$0xff] }
  0x15   :  { %v123_v7 = vld [vmem:[#allocation5 + $0x1c0] sm:$0xff]  ;;  %384 = vmatpush.msra.mxu3 %v315_v6  ;;  %v248_v6 = vld [vmem:[#allocation5 + $0x5a8] sm:$0xff] }
  0x16   :  { %v187_v8 = vld [vmem:[#allocation5 + $0x3c0] sm:$0xff]  ;;  %324 = vmatpush.msra.mxu0 %v123_v7  ;;  %v124_v7 = vld [vmem:[#allocation5 + $0x1c8] sm:$0xff] }
  0x17   :  { %v311_v9 = vld [vmem:[#allocation5 + $0x7a0] sm:$0xff]  ;;  %344 = vmatpush.msra.mxu1 %v187_v8  ;;  %v188_v8 = vld [vmem:[#allocation5 + $0x3c8] sm:$0xff] }
  0x18   :  { %v119_v10 = vld [vmem:[#allocation5 + $0x1a0] sm:$0xff]  ;;  %385 = vmatpush.msra.mxu3 %v311_v9  ;;  %v312_v9 = vld [vmem:[#allocation5 + $0x7a8] sm:$0xff] }
  0x19   :  { %v243_v11 = vld [vmem:[#allocation5 + $0x580] sm:$0xff]  ;;  %325 = vmatpush.msra.mxu0 %v119_v10  ;;  %v244_v10 = vld [vmem:[#allocation5 + $0x588] sm:$0xff] }
  0x1a   :  { %v183_v12 = vld [vmem:[#allocation5 + $0x3a0] sm:$0xff]  ;;  %366 = vmatpush.msra.mxu2 %v243_v11  ;;  %v120_v11 = vld [vmem:[#allocation5 + $0x1a8] sm:$0xff] }
  0x1b   :  { %v307_v13 = vld [vmem:[#allocation5 + $0x780] sm:$0xff]  ;;  %345 = vmatpush.msra.mxu1 %v183_v12  ;;  %v184_v12 = vld [vmem:[#allocation5 + $0x3a8] sm:$0xff] }
  0x1c   :  { %v115_v14 = vld [vmem:[#allocation5 + $0x180] sm:$0xff]  ;;  %386 = vmatpush.msra.mxu3 %v307_v13  ;;  %v308_v13 = vld [vmem:[#allocation5 + $0x788] sm:$0xff] }
  0x1d   :  { %v179_v15 = vld [vmem:[#allocation5 + $0x380] sm:$0xff]  ;;  %326 = vmatpush.msra.mxu0 %v115_v14  ;;  %v240_v14 = vld [vmem:[#allocation5 + $0x568] sm:$0xff] }
  0x1e   :  { %v239_v16 = vld [vmem:[#allocation5 + $0x560] sm:$0xff]  ;;  %346 = vmatpush.msra.mxu1 %v179_v15  ;;  %v116_v15 = vld [vmem:[#allocation5 + $0x188] sm:$0xff] }
  0x1f   :  { %v303_v17 = vld [vmem:[#allocation5 + $0x760] sm:$0xff]  ;;  %367 = vmatpush.msra.mxu2 %v239_v16  ;;  %v180_v16 = vld [vmem:[#allocation5 + $0x388] sm:$0xff] }
  0x20   :  { %v111_v18 = vld [vmem:[#allocation5 + $0x160] sm:$0xff]  ;;  %387 = vmatpush.msra.mxu3 %v303_v17  ;;  %v304_v17 = vld [vmem:[#allocation5 + $0x768] sm:$0xff] }
  0x21   :  { %v175_v19 = vld [vmem:[#allocation5 + $0x360] sm:$0xff]  ;;  %327 = vmatpush.msra.mxu0 %v111_v18  ;;  %v236_v18 = vld [vmem:[#allocation5 + $0x548] sm:$0xff] }
  0x22   :  { %v235_v20 = vld [vmem:[#allocation5 + $0x540] sm:$0xff]  ;;  %347 = vmatpush.msra.mxu1 %v175_v19  ;;  %v112_v19 = vld [vmem:[#allocation5 + $0x168] sm:$0xff] }
  0x23   :  { %v299_v21 = vld [vmem:[#allocation5 + $0x740] sm:$0xff]  ;;  %368 = vmatpush.msra.mxu2 %v235_v20  ;;  %v176_v20 = vld [vmem:[#allocation5 + $0x368] sm:$0xff] }
  0x24   :  { %v107_v22 = vld [vmem:[#allocation5 + $0x140] sm:$0xff]  ;;  %388 = vmatpush.msra.mxu3 %v299_v21  ;;  %v300_v21 = vld [vmem:[#allocation5 + $0x748] sm:$0xff] }
  0x25   :  { %v171_v23 = vld [vmem:[#allocation5 + $0x340] sm:$0xff]  ;;  %328 = vmatpush.msra.mxu0 %v107_v22  ;;  %v232_v22 = vld [vmem:[#allocation5 + $0x528] sm:$0xff] }
  0x26   :  { %v231_v24 = vld [vmem:[#allocation5 + $0x520] sm:$0xff]  ;;  %348 = vmatpush.msra.mxu1 %v171_v23  ;;  %v108_v23 = vld [vmem:[#allocation5 + $0x148] sm:$0xff] }
  0x27   :  { %v295_v25 = vld [vmem:[#allocation5 + $0x720] sm:$0xff]  ;;  %369 = vmatpush.msra.mxu2 %v231_v24  ;;  %v172_v24 = vld [vmem:[#allocation5 + $0x348] sm:$0xff] }
  0x28   :  { %v103_v26 = vld [vmem:[#allocation5 + $0x120] sm:$0xff]  ;;  %389 = vmatpush.msra.mxu3 %v295_v25  ;;  %v296_v25 = vld [vmem:[#allocation5 + $0x728] sm:$0xff] }
  0x29   :  { %v167_v27 = vld [vmem:[#allocation5 + $0x320] sm:$0xff]  ;;  %329 = vmatpush.msra.mxu0 %v103_v26  ;;  %v228_v26 = vld [vmem:[#allocation5 + $0x508] sm:$0xff] }
  0x2a   :  { %v227_v28 = vld [vmem:[#allocation5 + $0x500] sm:$0xff]  ;;  %349 = vmatpush.msra.mxu1 %v167_v27  ;;  %v104_v27 = vld [vmem:[#allocation5 + $0x128] sm:$0xff] }
  0x2b   :  { %v291_v29 = vld [vmem:[#allocation5 + $0x700] sm:$0xff]  ;;  %370 = vmatpush.msra.mxu2 %v227_v28  ;;  %v168_v28 = vld [vmem:[#allocation5 + $0x328] sm:$0xff] }
  0x2c   :  { %v99_v30 = vld [vmem:[#allocation5 + $0x100] sm:$0xff]  ;;  %390 = vmatpush.msra.mxu3 %v291_v29  ;;  %v292_v29 = vld [vmem:[#allocation5 + $0x708] sm:$0xff] }
  0x2d   :  { %v163_v31 = vld [vmem:[#allocation5 + $0x300] sm:$0xff]  ;;  %330 = vmatpush.msra.mxu0 %v99_v30  ;;  %v224_v30 = vld [vmem:[#allocation5 + $0x4e8] sm:$0xff] }
  0x2e   :  { %v223_v32 = vld [vmem:[#allocation5 + $0x4e0] sm:$0xff]  ;;  %350 = vmatpush.msra.mxu1 %v163_v31  ;;  %v100_v31 = vld [vmem:[#allocation5 + $0x108] sm:$0xff] }
  0x2f   :  { %v287_v33 = vld [vmem:[#allocation5 + $0x6e0] sm:$0xff]  ;;  %371 = vmatpush.msra.mxu2 %v223_v32  ;;  %v164_v32 = vld [vmem:[#allocation5 + $0x308] sm:$0xff] }
  0x30   :  { %v95_v34 = vld [vmem:[#allocation5 + $0xe0] sm:$0xff]  ;;  %391 = vmatpush.msra.mxu3 %v287_v33  ;;  %v288_v33 = vld [vmem:[#allocation5 + $0x6e8] sm:$0xff] }
  0x31   :  { %v159_v35 = vld [vmem:[#allocation5 + $0x2e0] sm:$0xff]  ;;  %331 = vmatpush.msra.mxu0 %v95_v34  ;;  %v220_v34 = vld [vmem:[#allocation5 + $0x4c8] sm:$0xff] }
  0x32   :  { %v219_v36 = vld [vmem:[#allocation5 + $0x4c0] sm:$0xff]  ;;  %351 = vmatpush.msra.mxu1 %v159_v35  ;;  %v96_v35 = vld [vmem:[#allocation5 + $0xe8] sm:$0xff] }
  0x33   :  { %v283_v37 = vld [vmem:[#allocation5 + $0x6c0] sm:$0xff]  ;;  %372 = vmatpush.msra.mxu2 %v219_v36  ;;  %v160_v36 = vld [vmem:[#allocation5 + $0x2e8] sm:$0xff] }
  0x34   :  { %v91_v38 = vld [vmem:[#allocation5 + $0xc0] sm:$0xff]  ;;  %392 = vmatpush.msra.mxu3 %v283_v37  ;;  %v284_v37 = vld [vmem:[#allocation5 + $0x6c8] sm:$0xff] }
  0x35   :  { %v155_v39 = vld [vmem:[#allocation5 + $0x2c0] sm:$0xff]  ;;  %332 = vmatpush.msra.mxu0 %v91_v38  ;;  %v216_v38 = vld [vmem:[#allocation5 + $0x4a8] sm:$0xff] }
  0x36   :  { %v215_v40 = vld [vmem:[#allocation5 + $0x4a0] sm:$0xff]  ;;  %352 = vmatpush.msra.mxu1 %v155_v39  ;;  %v92_v39 = vld [vmem:[#allocation5 + $0xc8] sm:$0xff] }
  0x37   :  { %v279_v41 = vld [vmem:[#allocation5 + $0x6a0] sm:$0xff]  ;;  %373 = vmatpush.msra.mxu2 %v215_v40  ;;  %v156_v40 = vld [vmem:[#allocation5 + $0x2c8] sm:$0xff] }
  0x38   :  { %v87_v42 = vld [vmem:[#allocation5 + $0xa0] sm:$0xff]  ;;  %393 = vmatpush.msra.mxu3 %v279_v41  ;;  %v280_v41 = vld [vmem:[#allocation5 + $0x6a8] sm:$0xff] }
  0x39   :  { %v151_v43 = vld [vmem:[#allocation5 + $0x2a0] sm:$0xff]  ;;  %333 = vmatpush.msra.mxu0 %v87_v42  ;;  %v212_v42 = vld [vmem:[#allocation5 + $0x488] sm:$0xff] }
  0x3a   :  { %v211_v44 = vld [vmem:[#allocation5 + $0x480] sm:$0xff]  ;;  %353 = vmatpush.msra.mxu1 %v151_v43  ;;  %v88_v43 = vld [vmem:[#allocation5 + $0xa8] sm:$0xff] }
  0x3b   :  { %v275_v45 = vld [vmem:[#allocation5 + $0x680] sm:$0xff]  ;;  %374 = vmatpush.msra.mxu2 %v211_v44  ;;  %v994_v44 = vld [vmem:[#allocation2 + $0x10] sm:$0xff] }
  0x3c   :  { %v83_v46 = vld [vmem:[#allocation5 + $0x80] sm:$0xff]  ;;  %394 = vmatpush.msra.mxu3 %v275_v45  ;;  %v152_v45 = vld [vmem:[#allocation5 + $0x2a8] sm:$0xff] }
  0x3d   :  { %v147_v47 = vld [vmem:[#allocation5 + $0x280] sm:$0xff]  ;;  %334 = vmatpush.msra.mxu0 %v83_v46  ;;  %v208_v46 = vld [vmem:[#allocation5 + $0x468] sm:$0xff] }
  0x3e   :  { %v207_v48 = vld [vmem:[#allocation5 + $0x460] sm:$0xff]  ;;  %354 = vmatpush.msra.mxu1 %v147_v47  ;;  %v276_v47 = vld [vmem:[#allocation5 + $0x688] sm:$0xff] }
  0x3f   :  { %v271_v49 = vld [vmem:[#allocation5 + $0x660] sm:$0xff]  ;;  %375 = vmatpush.msra.mxu2 %v207_v48  ;;  %v996_v48 = vld [vmem:[#allocation2 + $0x18] sm:$0xff] }
  0x40   :  { %v79_v50 = vld [vmem:[#allocation5 + $0x60] sm:$0xff]  ;;  %395 = vmatpush.msra.mxu3 %v271_v49  ;;  %v84_v49 = vld [vmem:[#allocation5 + $0x88] sm:$0xff] }
  0x41   :  { %v143_v51 = vld [vmem:[#allocation5 + $0x260] sm:$0xff]  ;;  %335 = vmatpush.msra.mxu0 %v79_v50  ;;  %v148_v50 = vld [vmem:[#allocation5 + $0x288] sm:$0xff] }
  0x42   :  { %v203_v52 = vld [vmem:[#allocation5 + $0x440] sm:$0xff]  ;;  %355 = vmatpush.msra.mxu1 %v143_v51  ;;  %v204_v51 = vld [vmem:[#allocation5 + $0x448] sm:$0xff] }
  0x43   :  { %v267_v53 = vld [vmem:[#allocation5 + $0x640] sm:$0xff]  ;;  %376 = vmatpush.msra.mxu2 %v203_v52  ;;  %v272_v52 = vld [vmem:[#allocation5 + $0x668] sm:$0xff] }
  0x44   :  { %v75_v54 = vld [vmem:[#allocation5 + $0x40] sm:$0xff]  ;;  %396 = vmatpush.msra.mxu3 %v267_v53 }
  0x45   :  { %v139_v55 = vld [vmem:[#allocation5 + $0x240] sm:$0xff]  ;;  %336 = vmatpush.msra.mxu0 %v75_v54  ;;  %v1002_v54 = vld [vmem:[#allocation2 + $0x8] sm:$0xff] }
  0x46   :  { %v199_v56 = vld [vmem:[#allocation5 + $0x420] sm:$0xff]  ;;  %356 = vmatpush.msra.mxu1 %v139_v55  ;;  %v80_v55 = vld [vmem:[#allocation5 + $0x68] sm:$0xff] }
  0x47   :  { %v263_v57 = vld [vmem:[#allocation5 + $0x620] sm:$0xff]  ;;  %377 = vmatpush.msra.mxu2 %v199_v56  ;;  %v144_v56 = vld [vmem:[#allocation5 + $0x268] sm:$0xff] }
  0x48   :  { %v71_v58 = vld [vmem:[#allocation5 + $0x20] sm:$0xff]  ;;  %397 = vmatpush.msra.mxu3 %v263_v57  ;;  %v200_v57 = vld [vmem:[#allocation5 + $0x428] sm:$0xff] }
  0x49   :  { %v135_v59 = vld [vmem:[#allocation5 + $0x220] sm:$0xff]  ;;  %337 = vmatpush.msra.mxu0 %v71_v58  ;;  %v268_v58 = vld [vmem:[#allocation5 + $0x648] sm:$0xff] }
  0x4a   :  { %v195_v60 = vld [vmem:[#allocation5 + $0x400] sm:$0xff]  ;;  %357 = vmatpush.msra.mxu1 %v135_v59  ;;  %v76_v59 = vld [vmem:[#allocation5 + $0x48] sm:$0xff] }
  0x4b   :  { %v259_v61 = vld [vmem:[#allocation5 + $0x600] sm:$0xff]  ;;  %378 = vmatpush.msra.mxu2 %v195_v60  ;;  %v140_v60 = vld [vmem:[#allocation5 + $0x248] sm:$0xff] }
  0x4c   :  { %v67_v0 = vld [vmem:[#allocation5] sm:$0xff]  ;;  %398 = vmatpush.msra.mxu3 %v259_v61  ;;  %379 = vmatmul.f32.vlgmr.msra.gmra.mxu2 %v994_v44  ;;  %v196_v61 = vld [vmem:[#allocation5 + $0x408] sm:$0xff] }
  0x4d   :  { %v131_v1 = vld [vmem:[#allocation5 + $0x200] sm:$0xff]  ;;  %443 = vmatpush.msrb.mxu2 %v256_v62  ;;  %338 = vmatpush.msra.mxu0 %v67_v0  ;;  %v264_v62 = vld [vmem:[#allocation5 + $0x628] sm:$0xff] }
  0x4e   :  { %463 = vmatpush.msrb.mxu3 %v320_v63  ;;  %358 = vmatpush.msra.mxu1 %v131_v1  ;;  %v999_v53 = vld [vmem:[#allocation2] sm:$0xff]  ;;  %v257_v63 = vld [vmem:[#allocation5 + $0x5f0] sm:$0xff]  ;;  %v72_v0 = vld [vmem:[#allocation5 + $0x28] sm:$0xff] }
  0x4f   :  { %444 = vmatpush.msrb.mxu2 %v252_v2  ;;  %403 = vmatpush.msrb.mxu0 %v128_v3  ;;  %v136_v1 = vld [vmem:[#allocation5 + $0x228] sm:$0xff]  ;;  %v253_v3 = vld [vmem:[#allocation5 + $0x5d0] sm:$0xff] }
  0x50   :  { %423 = vmatpush.msrb.mxu1 %v192_v4  ;;  %464 = vmatpush.msrb.mxu3 %v316_v5  ;;  %v260_v2 = vld [vmem:[#allocation5 + $0x608] sm:$0xff]  ;;  %v321_v4 = vld [vmem:[#allocation5 + $0x7f0] sm:$0xff] }
  0x51   :  { %445 = vmatpush.msrb.mxu2 %v248_v6  ;;  %404 = vmatpush.msrb.mxu0 %v124_v7  ;;  %v68_v5 = vld [vmem:[#allocation5 + $0x8] sm:$0xff]  ;;  %v129_v7 = vld [vmem:[#allocation5 + $0x1f0] sm:$0xff] }
  0x52   :  { %424 = vmatpush.msrb.mxu1 %v188_v8  ;;  %465 = vmatpush.msrb.mxu3 %v312_v9  ;;  %v132_v6 = vld [vmem:[#allocation5 + $0x208] sm:$0xff]  ;;  %v193_v8 = vld [vmem:[#allocation5 + $0x3f0] sm:$0xff] }
  0x53   :  { %446 = vmatpush.msrb.mxu2 %v244_v10  ;;  %405 = vmatpush.msrb.mxu0 %v120_v11  ;;  %v249_v9 = vld [vmem:[#allocation5 + $0x5b0] sm:$0xff] }
  0x54   :  { %425 = vmatpush.msrb.mxu1 %v184_v12  ;;  %466 = vmatpush.msrb.mxu3 %v308_v13  ;;  %v317_v10 = vld [vmem:[#allocation5 + $0x7d0] sm:$0xff] }
  0x55   :  { %447 = vmatpush.msrb.mxu2 %v240_v14  ;;  %406 = vmatpush.msrb.mxu0 %v116_v15  ;;  %v125_v11 = vld [vmem:[#allocation5 + $0x1d0] sm:$0xff] }
  0x56   :  { %426 = vmatpush.msrb.mxu1 %v180_v16  ;;  %467 = vmatpush.msrb.mxu3 %v304_v17  ;;  %v189_v12 = vld [vmem:[#allocation5 + $0x3d0] sm:$0xff] }
  0x57   :  { %448 = vmatpush.msrb.mxu2 %v236_v18  ;;  %407 = vmatpush.msrb.mxu0 %v112_v19  ;;  %v245_v13 = vld [vmem:[#allocation5 + $0x590] sm:$0xff] }
  0x58   :  { %427 = vmatpush.msrb.mxu1 %v176_v20  ;;  %468 = vmatpush.msrb.mxu3 %v300_v21  ;;  %v313_v14 = vld [vmem:[#allocation5 + $0x7b0] sm:$0xff] }
  0x59   :  { %449 = vmatpush.msrb.mxu2 %v232_v22  ;;  %408 = vmatpush.msrb.mxu0 %v108_v23  ;;  %v121_v15 = vld [vmem:[#allocation5 + $0x1b0] sm:$0xff] }
  0x5a   :  { %428 = vmatpush.msrb.mxu1 %v172_v24  ;;  %469 = vmatpush.msrb.mxu3 %v296_v25  ;;  %v185_v16 = vld [vmem:[#allocation5 + $0x3b0] sm:$0xff] }
  0x5b   :  { %450 = vmatpush.msrb.mxu2 %v228_v26  ;;  %409 = vmatpush.msrb.mxu0 %v104_v27  ;;  %v241_v17 = vld [vmem:[#allocation5 + $0x570] sm:$0xff] }
  0x5c   :  { %429 = vmatpush.msrb.mxu1 %v168_v28  ;;  %470 = vmatpush.msrb.mxu3 %v292_v29  ;;  %v309_v18 = vld [vmem:[#allocation5 + $0x790] sm:$0xff] }
  0x5d   :  { %451 = vmatpush.msrb.mxu2 %v224_v30  ;;  %410 = vmatpush.msrb.mxu0 %v100_v31  ;;  %v117_v19 = vld [vmem:[#allocation5 + $0x190] sm:$0xff] }
  0x5e   :  { %430 = vmatpush.msrb.mxu1 %v164_v32  ;;  %471 = vmatpush.msrb.mxu3 %v288_v33  ;;  %v181_v20 = vld [vmem:[#allocation5 + $0x390] sm:$0xff] }
  0x5f   :  { %452 = vmatpush.msrb.mxu2 %v220_v34  ;;  %411 = vmatpush.msrb.mxu0 %v96_v35  ;;  %v237_v21 = vld [vmem:[#allocation5 + $0x550] sm:$0xff] }
  0x60   :  { %431 = vmatpush.msrb.mxu1 %v160_v36  ;;  %472 = vmatpush.msrb.mxu3 %v284_v37  ;;  %v305_v22 = vld [vmem:[#allocation5 + $0x770] sm:$0xff] }
  0x61   :  { %453 = vmatpush.msrb.mxu2 %v216_v38  ;;  %412 = vmatpush.msrb.mxu0 %v92_v39  ;;  %v113_v23 = vld [vmem:[#allocation5 + $0x170] sm:$0xff] }
  0x62   :  { %432 = vmatpush.msrb.mxu1 %v156_v40  ;;  %473 = vmatpush.msrb.mxu3 %v280_v41  ;;  %v177_v24 = vld [vmem:[#allocation5 + $0x370] sm:$0xff] }
  0x63   :  { %454 = vmatpush.msrb.mxu2 %v212_v42  ;;  %413 = vmatpush.msrb.mxu0 %v88_v43  ;;  %v233_v25 = vld [vmem:[#allocation5 + $0x530] sm:$0xff] }
  0x64   :  { %433 = vmatpush.msrb.mxu1 %v152_v45  ;;  %474 = vmatpush.msrb.mxu3 %v276_v47  ;;  %v301_v26 = vld [vmem:[#allocation5 + $0x750] sm:$0xff] }
  0x65   :  { %455 = vmatpush.msrb.mxu2 %v208_v46  ;;  %399 = vmatmul.f32.vlgmr.msra.gmra.mxu3 %v996_v48  ;;  %v109_v27 = vld [vmem:[#allocation5 + $0x150] sm:$0xff] }
  0x66   :  { %414 = vmatpush.msrb.mxu0 %v84_v49  ;;  %434 = vmatpush.msrb.mxu1 %v148_v50  ;;  %v173_v28 = vld [vmem:[#allocation5 + $0x350] sm:$0xff] }
  0x67   :  { %456 = vmatpush.msrb.mxu2 %v204_v51  ;;  %475 = vmatpush.msrb.mxu3 %v272_v52  ;;  %v229_v29 = vld [vmem:[#allocation5 + $0x510] sm:$0xff] }
  0x68   :  { %339 = vmatmul.f32.vlgmr.msra.gmra.mxu0 %v999_v53  ;;  %359 = vmatmul.f32.vlgmr.msra.gmra.mxu1 %v1002_v54  ;;  %v297_v30 = vld [vmem:[#allocation5 + $0x730] sm:$0xff] }
  0x69   :  { %415 = vmatpush.msrb.mxu0 %v80_v55  ;;  %435 = vmatpush.msrb.mxu1 %v144_v56  ;;  %v105_v31 = vld [vmem:[#allocation5 + $0x130] sm:$0xff] }
  0x6a   :  { %457 = vmatpush.msrb.mxu2 %v200_v57  ;;  %476 = vmatpush.msrb.mxu3 %v268_v58  ;;  %v169_v32 = vld [vmem:[#allocation5 + $0x330] sm:$0xff] }
  0x6b   :  { %416 = vmatpush.msrb.mxu0 %v76_v59  ;;  %436 = vmatpush.msrb.mxu1 %v140_v60  ;;  %v225_v33 = vld [vmem:[#allocation5 + $0x4f0] sm:$0xff] }
  0x6c   :  { %458 = vmatpush.msrb.mxu2 %v196_v61  ;;  %477 = vmatpush.msrb.mxu3 %v264_v62  ;;  %v293_v34 = vld [vmem:[#allocation5 + $0x710] sm:$0xff] }
  0x6d   :  { %459 = vmatmul.f32.vlgmr.msrb.gmra.mxu2 %v994_v44  ;;  %417 = vmatpush.msrb.mxu0 %v72_v0  ;;  %v101_v35 = vld [vmem:[#allocation5 + $0x110] sm:$0xff] }
  0x6e   :  { %523 = vmatpush.msra.mxu2 %v257_v63  ;;  %437 = vmatpush.msrb.mxu1 %v136_v1  ;;  %v165_v36 = vld [vmem:[#allocation5 + $0x310] sm:$0xff] }
  0x6f   :  { %478 = vmatpush.msrb.mxu3 %v260_v2  ;;  %418 = vmatpush.msrb.mxu0 %v68_v5  ;;  %v221_v37 = vld [vmem:[#allocation5 + $0x4d0] sm:$0xff] }
  0x70   :  { %479 = vmatmul.f32.vlgmr.msrb.gmra.mxu3 %v996_v48  ;;  %524 = vmatpush.msra.mxu2 %v253_v3  ;;  %v289_v38 = vld [vmem:[#allocation5 + $0x6f0] sm:$0xff]  ;;  %v258_v3 = vld [vmem:[#allocation5 + $0x5f8] sm:$0xff] }
  0x71   :  { %543 = vmatpush.msra.mxu3 %v321_v4  ;;  %438 = vmatpush.msrb.mxu1 %v132_v6  ;;  %v97_v39 = vld [vmem:[#allocation5 + $0xf0] sm:$0xff] }
  0x72   :  { %419 = vmatmul.f32.vlgmr.msrb.gmra.mxu0 %v999_v53  ;;  %439 = vmatmul.f32.vlgmr.msrb.gmra.mxu1 %v1002_v54  ;;  %v161_v40 = vld [vmem:[#allocation5 + $0x2f0] sm:$0xff] }
  0x73   :  { %483 = vmatpush.msra.mxu0 %v129_v7  ;;  %503 = vmatpush.msra.mxu1 %v193_v8  ;;  %v217_v41 = vld [vmem:[#allocation5 + $0x4b0] sm:$0xff]  ;;  %v254_v7 = vld [vmem:[#allocation5 + $0x5d8] sm:$0xff] }
  0x74   :  { %525 = vmatpush.msra.mxu2 %v249_v9  ;;  %544 = vmatpush.msra.mxu3 %v317_v10  ;;  %v285_v42 = vld [vmem:[#allocation5 + $0x6d0] sm:$0xff]  ;;  %v322_v8 = vld [vmem:[#allocation5 + $0x7f8] sm:$0xff] }
  0x75   :  { %484 = vmatpush.msra.mxu0 %v125_v11  ;;  %504 = vmatpush.msra.mxu1 %v189_v12  ;;  %v93_v43 = vld [vmem:[#allocation5 + $0xd0] sm:$0xff]  ;;  %v130_v11 = vld [vmem:[#allocation5 + $0x1f8] sm:$0xff] }
  0x76   :  { %526 = vmatpush.msra.mxu2 %v245_v13  ;;  %545 = vmatpush.msra.mxu3 %v313_v14  ;;  %v157_v45 = vld [vmem:[#allocation5 + $0x2d0] sm:$0xff]  ;;  %v194_v12 = vld [vmem:[#allocation5 + $0x3f8] sm:$0xff] }
  0x77   :  { %485 = vmatpush.msra.mxu0 %v121_v15  ;;  %505 = vmatpush.msra.mxu1 %v185_v16  ;;  %v213_v46 = vld [vmem:[#allocation5 + $0x490] sm:$0xff]  ;;  %v250_v13 = vld [vmem:[#allocation5 + $0x5b8] sm:$0xff] }
  0x78   :  { %527 = vmatpush.msra.mxu2 %v241_v17  ;;  %546 = vmatpush.msra.mxu3 %v309_v18  ;;  %v281_v47 = vld [vmem:[#allocation5 + $0x6b0] sm:$0xff]  ;;  %v318_v14 = vld [vmem:[#allocation5 + $0x7d8] sm:$0xff] }
  0x79   :  { %486 = vmatpush.msra.mxu0 %v117_v19  ;;  %506 = vmatpush.msra.mxu1 %v181_v20  ;;  %v89_v49 = vld [vmem:[#allocation5 + $0xb0] sm:$0xff]  ;;  %v126_v15 = vld [vmem:[#allocation5 + $0x1d8] sm:$0xff] }
  0x7a   :  { %528 = vmatpush.msra.mxu2 %v237_v21  ;;  %547 = vmatpush.msra.mxu3 %v305_v22  ;;  %v153_v50 = vld [vmem:[#allocation5 + $0x2b0] sm:$0xff]  ;;  %v190_v16 = vld [vmem:[#allocation5 + $0x3d8] sm:$0xff] }
  0x7b   :  { %487 = vmatpush.msra.mxu0 %v113_v23  ;;  %507 = vmatpush.msra.mxu1 %v177_v24  ;;  %v209_v51 = vld [vmem:[#allocation5 + $0x470] sm:$0xff]  ;;  %v246_v17 = vld [vmem:[#allocation5 + $0x598] sm:$0xff] }
  0x7c   :  { %529 = vmatpush.msra.mxu2 %v233_v25  ;;  %548 = vmatpush.msra.mxu3 %v301_v26  ;;  %v277_v52 = vld [vmem:[#allocation5 + $0x690] sm:$0xff]  ;;  %v314_v18 = vld [vmem:[#allocation5 + $0x7b8] sm:$0xff] }
  0x7d   :  { %488 = vmatpush.msra.mxu0 %v109_v27  ;;  %508 = vmatpush.msra.mxu1 %v173_v28  ;;  %v85_v55 = vld [vmem:[#allocation5 + $0x90] sm:$0xff]  ;;  %v122_v19 = vld [vmem:[#allocation5 + $0x1b8] sm:$0xff] }
  0x7e   :  { %530 = vmatpush.msra.mxu2 %v229_v29  ;;  %549 = vmatpush.msra.mxu3 %v297_v30  ;;  %v149_v56 = vld [vmem:[#allocation5 + $0x290] sm:$0xff]  ;;  %v186_v20 = vld [vmem:[#allocation5 + $0x3b8] sm:$0xff] }
  0x7f   :  { %489 = vmatpush.msra.mxu0 %v105_v31  ;;  %509 = vmatpush.msra.mxu1 %v169_v32  ;;  %v205_v57 = vld [vmem:[#allocation5 + $0x450] sm:$0xff]  ;;  %v242_v21 = vld [vmem:[#allocation5 + $0x578] sm:$0xff] }
  0x80   :  { %531 = vmatpush.msra.mxu2 %v225_v33  ;;  %550 = vmatpush.msra.mxu3 %v293_v34  ;;  %v273_v58 = vld [vmem:[#allocation5 + $0x670] sm:$0xff]  ;;  %v310_v22 = vld [vmem:[#allocation5 + $0x798] sm:$0xff] }
  0x81   :  { %490 = vmatpush.msra.mxu0 %v101_v35  ;;  %510 = vmatpush.msra.mxu1 %v165_v36  ;;  %v81_v59 = vld [vmem:[#allocation5 + $0x70] sm:$0xff]  ;;  %v118_v23 = vld [vmem:[#allocation5 + $0x198] sm:$0xff] }
  0x82   :  { %532 = vmatpush.msra.mxu2 %v221_v37  ;;  %551 = vmatpush.msra.mxu3 %v289_v38  ;;  %v145_v60 = vld [vmem:[#allocation5 + $0x270] sm:$0xff]  ;;  %v182_v24 = vld [vmem:[#allocation5 + $0x398] sm:$0xff] }
  0x83   :  { %491 = vmatpush.msra.mxu0 %v97_v39  ;;  %511 = vmatpush.msra.mxu1 %v161_v40  ;;  %v201_v61 = vld [vmem:[#allocation5 + $0x430] sm:$0xff]  ;;  %v238_v25 = vld [vmem:[#allocation5 + $0x558] sm:$0xff] }
  0x84   :  { %533 = vmatpush.msra.mxu2 %v217_v41  ;;  %552 = vmatpush.msra.mxu3 %v285_v42  ;;  %v269_v62 = vld [vmem:[#allocation5 + $0x650] sm:$0xff]  ;;  %v306_v26 = vld [vmem:[#allocation5 + $0x778] sm:$0xff] }
  0x85   :  { %492 = vmatpush.msra.mxu0 %v93_v43  ;;  %512 = vmatpush.msra.mxu1 %v157_v45  ;;  %v77_v63 = vld [vmem:[#allocation5 + $0x50] sm:$0xff]  ;;  %v114_v27 = vld [vmem:[#allocation5 + $0x178] sm:$0xff] }
  0x86   :  { %534 = vmatpush.msra.mxu2 %v213_v46  ;;  %553 = vmatpush.msra.mxu3 %v281_v47  ;;  %v141_v0 = vld [vmem:[#allocation5 + $0x250] sm:$0xff]  ;;  %v178_v28 = vld [vmem:[#allocation5 + $0x378] sm:$0xff] }
  0x87   :  { %493 = vmatpush.msra.mxu0 %v89_v49  ;;  %513 = vmatpush.msra.mxu1 %v153_v50  ;;  %v197_v1 = vld [vmem:[#allocation5 + $0x410] sm:$0xff]  ;;  %v234_v29 = vld [vmem:[#allocation5 + $0x538] sm:$0xff] }
  0x88   :  { %535 = vmatpush.msra.mxu2 %v209_v51  ;;  %554 = vmatpush.msra.mxu3 %v277_v52  ;;  %v265_v2 = vld [vmem:[#allocation5 + $0x630] sm:$0xff]  ;;  %v302_v30 = vld [vmem:[#allocation5 + $0x758] sm:$0xff] }
  0x89   :  { %494 = vmatpush.msra.mxu0 %v85_v55  ;;  %514 = vmatpush.msra.mxu1 %v149_v56  ;;  %v73_v4 = vld [vmem:[#allocation5 + $0x30] sm:$0xff]  ;;  %v110_v31 = vld [vmem:[#allocation5 + $0x158] sm:$0xff] }
  0x8a   :  { %536 = vmatpush.msra.mxu2 %v205_v57  ;;  %555 = vmatpush.msra.mxu3 %v273_v58  ;;  %v137_v5 = vld [vmem:[#allocation5 + $0x230] sm:$0xff]  ;;  %v174_v32 = vld [vmem:[#allocation5 + $0x358] sm:$0xff] }
  0x8b   :  { %495 = vmatpush.msra.mxu0 %v81_v59  ;;  %515 = vmatpush.msra.mxu1 %v145_v60  ;;  %v261_v6 = vld [vmem:[#allocation5 + $0x610] sm:$0xff]  ;;  %v230_v33 = vld [vmem:[#allocation5 + $0x518] sm:$0xff] }
  0x8c   :  { %537 = vmatpush.msra.mxu2 %v201_v61  ;;  %556 = vmatpush.msra.mxu3 %v269_v62  ;;  %v69_v9 = vld [vmem:[#allocation5 + $0x10] sm:$0xff]  ;;  %v298_v34 = vld [vmem:[#allocation5 + $0x738] sm:$0xff] }
  0x8d   :  { %496 = vmatpush.msra.mxu0 %v77_v63  ;;  %516 = vmatpush.msra.mxu1 %v141_v0  ;;  %v133_v10 = vld [vmem:[#allocation5 + $0x210] sm:$0xff]  ;;  %v106_v35 = vld [vmem:[#allocation5 + $0x138] sm:$0xff] }
  0x8e   :  { %538 = vmatpush.msra.mxu2 %v197_v1  ;;  %557 = vmatpush.msra.mxu3 %v265_v2  ;;  %v170_v36 = vld [vmem:[#allocation5 + $0x338] sm:$0xff] }
  0x8f   :  { %539 = vmatmul.f32.vlgmr.msra.gmra.mxu2 %v994_v44  ;;  %497 = vmatpush.msra.mxu0 %v73_v4  ;;  %v226_v37 = vld [vmem:[#allocation5 + $0x4f8] sm:$0xff] }
  0x90   :  { %603 = vmatpush.msrb.mxu2 %v258_v3  ;;  %517 = vmatpush.msra.mxu1 %v137_v5  ;;  %v294_v38 = vld [vmem:[#allocation5 + $0x718] sm:$0xff] }
  0x91   :  { %558 = vmatpush.msra.mxu3 %v261_v6  ;;  %498 = vmatpush.msra.mxu0 %v69_v9  ;;  %v102_v39 = vld [vmem:[#allocation5 + $0x118] sm:$0xff] }
  0x92   :  { %559 = vmatmul.f32.vlgmr.msra.gmra.mxu3 %v996_v48  ;;  %604 = vmatpush.msrb.mxu2 %v254_v7  ;;  %v166_v40 = vld [vmem:[#allocation5 + $0x318] sm:$0xff] }
  0x93   :  { %623 = vmatpush.msrb.mxu3 %v322_v8  ;;  %518 = vmatpush.msra.mxu1 %v133_v10  ;;  %v222_v41 = vld [vmem:[#allocation5 + $0x4d8] sm:$0xff] }
  0x94   :  { %499 = vmatmul.f32.vlgmr.msra.gmra.mxu0 %v999_v53  ;;  %519 = vmatmul.f32.vlgmr.msra.gmra.mxu1 %v1002_v54  ;;  %v290_v42 = vld [vmem:[#allocation5 + $0x6f8] sm:$0xff] }
  0x95   :  { %563 = vmatpush.msrb.mxu0 %v130_v11  ;;  %583 = vmatpush.msrb.mxu1 %v194_v12  ;;  %v98_v43 = vld [vmem:[#allocation5 + $0xf8] sm:$0xff] }
  0x96   :  { %605 = vmatpush.msrb.mxu2 %v250_v13  ;;  %624 = vmatpush.msrb.mxu3 %v318_v14  ;;  %v162_v45 = vld [vmem:[#allocation5 + $0x2f8] sm:$0xff] }
  0x97   :  { %564 = vmatpush.msrb.mxu0 %v126_v15  ;;  %584 = vmatpush.msrb.mxu1 %v190_v16  ;;  %v218_v46 = vld [vmem:[#allocation5 + $0x4b8] sm:$0xff] }
  0x98   :  { %606 = vmatpush.msrb.mxu2 %v246_v17  ;;  %625 = vmatpush.msrb.mxu3 %v314_v18  ;;  %v286_v47 = vld [vmem:[#allocation5 + $0x6d8] sm:$0xff] }
  0x99   :  { %565 = vmatpush.msrb.mxu0 %v122_v19  ;;  %585 = vmatpush.msrb.mxu1 %v186_v20  ;;  %v94_v49 = vld [vmem:[#allocation5 + $0xd8] sm:$0xff] }
  0x9a   :  { %607 = vmatpush.msrb.mxu2 %v242_v21  ;;  %626 = vmatpush.msrb.mxu3 %v310_v22  ;;  %v158_v50 = vld [vmem:[#allocation5 + $0x2d8] sm:$0xff] }
  0x9b   :  { %566 = vmatpush.msrb.mxu0 %v118_v23  ;;  %586 = vmatpush.msrb.mxu1 %v182_v24  ;;  %v214_v51 = vld [vmem:[#allocation5 + $0x498] sm:$0xff] }
  0x9c   :  { %608 = vmatpush.msrb.mxu2 %v238_v25  ;;  %627 = vmatpush.msrb.mxu3 %v306_v26  ;;  %v282_v52 = vld [vmem:[#allocation5 + $0x6b8] sm:$0xff] }
  0x9d   :  { %567 = vmatpush.msrb.mxu0 %v114_v27  ;;  %587 = vmatpush.msrb.mxu1 %v178_v28  ;;  %v90_v55 = vld [vmem:[#allocation5 + $0xb8] sm:$0xff] }
  0x9e   :  { %609 = vmatpush.msrb.mxu2 %v234_v29  ;;  %628 = vmatpush.msrb.mxu3 %v302_v30  ;;  %v154_v56 = vld [vmem:[#allocation5 + $0x2b8] sm:$0xff] }
  0x9f   :  { %568 = vmatpush.msrb.mxu0 %v110_v31  ;;  %588 = vmatpush.msrb.mxu1 %v174_v32  ;;  %v210_v57 = vld [vmem:[#allocation5 + $0x478] sm:$0xff] }
  0xa0   :  { %610 = vmatpush.msrb.mxu2 %v230_v33  ;;  %629 = vmatpush.msrb.mxu3 %v298_v34  ;;  %v278_v58 = vld [vmem:[#allocation5 + $0x698] sm:$0xff] }
  0xa1   :  { %569 = vmatpush.msrb.mxu0 %v106_v35  ;;  %589 = vmatpush.msrb.mxu1 %v170_v36  ;;  %v86_v59 = vld [vmem:[#allocation5 + $0x98] sm:$0xff] }
  0xa2   :  { %611 = vmatpush.msrb.mxu2 %v226_v37  ;;  %630 = vmatpush.msrb.mxu3 %v294_v38  ;;  %v150_v60 = vld [vmem:[#allocation5 + $0x298] sm:$0xff] }
  0xa3   :  { %570 = vmatpush.msrb.mxu0 %v102_v39  ;;  %590 = vmatpush.msrb.mxu1 %v166_v40  ;;  %v206_v61 = vld [vmem:[#allocation5 + $0x458] sm:$0xff] }
  0xa4   :  { %612 = vmatpush.msrb.mxu2 %v222_v41  ;;  %631 = vmatpush.msrb.mxu3 %v290_v42  ;;  %v274_v62 = vld [vmem:[#allocation5 + $0x678] sm:$0xff]  ;;  %v651_v41 = vlaneseq }
  0xa5   :  { %571 = vmatpush.msrb.mxu0 %v98_v43  ;;  %591 = vmatpush.msrb.mxu1 %v162_v45  ;;  %v82_v63 = vld [vmem:[#allocation5 + $0x78] sm:$0xff] }
  0xa6   :  { %613 = vmatpush.msrb.mxu2 %v218_v46  ;;  %632 = vmatpush.msrb.mxu3 %v286_v47  ;;  %v146_v0 = vld [vmem:[#allocation5 + $0x278] sm:$0xff]  ;;  %v1025_v42 = vand.u32 127, %v651_v41 }
  0xa7   :  { %572 = vmatpush.msrb.mxu0 %v94_v49  ;;  %592 = vmatpush.msrb.mxu1 %v158_v50  ;;  %v202_v1 = vld [vmem:[#allocation5 + $0x438] sm:$0xff] }
  0xa8   :  { %614 = vmatpush.msrb.mxu2 %v214_v51  ;;  %633 = vmatpush.msrb.mxu3 %v282_v52  ;;  %v270_v2 = vld [vmem:[#allocation5 + $0x658] sm:$0xff]  ;;  %vm653_vm0 = vcmp.lt.s32.totalorder %v1025_v42, 32  ;;  %vm670_vm1 = vcmp.lt.s32.totalorder %v1025_v42, 64 }
  0xa9   :  { %573 = vmatpush.msrb.mxu0 %v90_v55  ;;  %593 = vmatpush.msrb.mxu1 %v154_v56  ;;  %v78_v3 = vld [vmem:[#allocation5 + $0x58] sm:$0xff] }
  0xaa   :  { %615 = vmatpush.msrb.mxu2 %v210_v57  ;;  %634 = vmatpush.msrb.mxu3 %v278_v58  ;;  %v142_v4 = vld [vmem:[#allocation5 + $0x258] sm:$0xff] }
  0xab   :  { %574 = vmatpush.msrb.mxu0 %v86_v59  ;;  %594 = vmatpush.msrb.mxu1 %v150_v60  ;;  %v198_v5 = vld [vmem:[#allocation5 + $0x418] sm:$0xff] }
  0xac   :  { %616 = vmatpush.msrb.mxu2 %v206_v61  ;;  %635 = vmatpush.msrb.mxu3 %v274_v62  ;;  %v266_v6 = vld [vmem:[#allocation5 + $0x638] sm:$0xff] }
  0xad   :  { %575 = vmatpush.msrb.mxu0 %v82_v63  ;;  %595 = vmatpush.msrb.mxu1 %v146_v0  ;;  %v74_v7 = vld [vmem:[#allocation5 + $0x38] sm:$0xff] }
  0xae   :  { %617 = vmatpush.msrb.mxu2 %v202_v1  ;;  %636 = vmatpush.msrb.mxu3 %v270_v2  ;;  %v138_v8 = vld [vmem:[#allocation5 + $0x238] sm:$0xff] }
  0xaf   :  { %576 = vmatpush.msrb.mxu0 %v78_v3  ;;  %596 = vmatpush.msrb.mxu1 %v142_v4  ;;  %v262_v9 = vld [vmem:[#allocation5 + $0x618] sm:$0xff] }
  0xb0   :  { %618 = vmatpush.msrb.mxu2 %v198_v5  ;;  %637 = vmatpush.msrb.mxu3 %v266_v6  ;;  %v70_v10 = vld [vmem:[#allocation5 + $0x18] sm:$0xff] }
  0xb1   :  { %619 = vmatmul.f32.vlgmr.msrb.gmra.mxu2 %v994_v44  ;;  %577 = vmatpush.msrb.mxu0 %v74_v7  ;;  %v134_v11 = vld [vmem:[#allocation5 + $0x218] sm:$0xff] }
  0xb2   :  { %597 = vmatpush.msrb.mxu1 %v138_v8  ;;  %638 = vmatpush.msrb.mxu3 %v262_v9 }
  0xb3   :  { %639 = vmatmul.f32.vlgmr.msrb.gmra.mxu3 %v996_v48  ;;  %578 = vmatpush.msrb.mxu0 %v70_v10 }
  0xb4   :  { %598 = vmatpush.msrb.mxu1 %v134_v11  ;;  %579 = vmatmul.f32.vlgmr.msrb.gmra.mxu0 %v999_v53 }
  0xb5   :  { %599 = vmatmul.f32.vlgmr.msrb.gmra.mxu1 %v1002_v54 }
  0xcf   :  { %v380_v15 = vpop.f32.mrf.mxu2 }
  0xe5   :  { %v340_v12 = vpop.f32.mrf.mxu0  ;;  %v360_v13 = vpop.f32.mrf.mxu1 }
  0xe6   :  { %v361_v14 = vadd.f32 %v360_v13, %v340_v12 }
  0xe8   :  { %v381_v16 = vadd.f32 %v380_v15, %v361_v14  ;;  %v400_v17 = vpop.f32.mrf.mxu3 }
  0xea   :  { %v1018_v18 = vadd.f32 %v400_v17, %v381_v16 }
  0xec   :  { %643 = vrot.lane.b32.xlu0 %v1018_v18, %s952_s24 }
  0xef   :  { %v420_v19 = vpop.f32.mrf.mxu0  ;;  %v440_v20 = vpop.f32.mrf.mxu1 }
  0xf0   :  { %v460_v21 = vpop.f32.mrf.mxu2  ;;  %v441_v22 = vadd.f32 %v440_v20, %v420_v19 }
  0xf2   :  { %v461_v23 = vadd.f32 %v460_v21, %v441_v22 }
  0xf3   :  { %v480_v24 = vpop.f32.mrf.mxu3 }
  0xf4   :  { %v481_v25 = vadd.f32 %v480_v24, %v461_v23 }
  0xf6   :  { %645 = vrot.lane.b32.xlu0 %v481_v25, %s952_s24 }
 0x111   :  { %v500_v26 = vpop.f32.mrf.mxu0  ;;  %v520_v27 = vpop.f32.mrf.mxu1 }
 0x112   :  { %v540_v28 = vpop.f32.mrf.mxu2  ;;  %v521_v29 = vadd.f32 %v520_v27, %v500_v26 }
 0x114   :  { %v541_v30 = vadd.f32 %v540_v28, %v521_v29 }
 0x115   :  { %v560_v31 = vpop.f32.mrf.mxu3 }
 0x116   :  { %v561_v32 = vadd.f32 %v560_v31, %v541_v30 }
 0x118   :  { %647 = vrot.lane.b32.xlu1 %v561_v32, %s952_s24 }
 0x131   :  { %v580_v33 = vpop.f32.mrf.mxu0 }
 0x132   :  { %v600_v34 = vpop.f32.mrf.mxu1 }
 0x133   :  { %v601_v35 = vadd.f32 %v600_v34, %v580_v33 }
 0x134   :  { %v620_v36 = vpop.f32.mrf.mxu2 }
 0x135   :  { %v621_v37 = vadd.f32 %v620_v36, %v601_v35 }
 0x136   :  { %v640_v38 = vpop.f32.mrf.mxu3 }
 0x137   :  { %v641_v39 = vadd.f32 %v640_v38, %v621_v37 }
 0x139   :  { %649 = vrot.lane.b32.xlu1 %v641_v39, %s952_s24 }
 0x15e   :  { %v644_v40 = vpop.permute.xlu0 %643 }
 0x168   :  { %v646_v43 = vpop.permute.xlu0 %645 }
 0x169   :  { %v656_v56 = vsel %vm653_vm0, %v644_v40, %v646_v43 }
 0x16a   :  { %v659_v57 = vmax.f32 %v481_v25, %v656_v56 }
 0x18a   :  { %v648_v45 = vpop.permute.xlu1 %647 }
 0x18b   :  { %v655_v46 = vsel %vm653_vm0, %v646_v43, %v648_v45 }
 0x18c   :  { %v660_v47 = vmax.f32 %v561_v32, %v655_v46 }
 0x18e   :  { %666 = vrot.lane.b32.xlu0 %v660_v47, %s957_s0 }
 0x1ab   :  { %v650_v49 = vpop.permute.xlu1 %649 }
 0x1ac   :  { %v654_v50 = vsel %vm653_vm0, %v648_v45, %v650_v49  ;;  %v657_v51 = vsel %vm653_vm0, %v650_v49, %v644_v40 }
 0x1ad   :  { %v661_v52 = vmax.f32 %v641_v39, %v654_v50  ;;  %v658_v55 = vmax.f32 %v1018_v18, %v657_v51  ;;  %v779_v51 = vld [vmem:[#allocation7 + $0x18] sm:$0xff] }
 0x1ae   :  { %800 = vmatpush.msra.mxu0 %v779_v51 }
 0x1af   :  { %668 = vrot.lane.b32.xlu1 %v661_v52, %s957_s0  ;;  %662 = vrot.lane.b32.xlu2 %v658_v55, %s957_s0 }
 0x1b7   :  { %664 = vrot.lane.b32.xlu2 %v659_v57, %s957_s0 }
 0x200   :  { %v667_v60 = vpop.permute.xlu0 %666 }
 0x209   :  { %v663_v58 = vpop.permute.xlu2 %662 }
 0x211   :  { %v665_v59 = vpop.permute.xlu2 %664 }
 0x212   :  { %v672_v61 = vsel %vm670_vm1, %v665_v59, %v667_v60  ;;  %v673_v62 = vsel %vm670_vm1, %v663_v58, %v665_v59 }
 0x213   :  { %v676_v63 = vmax.f32 %v659_v57, %v673_v62  ;;  %v677_v0 = vmax.f32 %v660_v47, %v672_v61  ;;  %v776_v57 = vld [vmem:[#allocation7] sm:$0xff] }
 0x215   :  { %v681_v6 = vmax.f32 %v677_v0, %v676_v63 }
 0x221   :  { %v669_v1 = vpop.permute.xlu1 %668 }
 0x222   :  { %v671_v2 = vsel %vm670_vm1, %v667_v60, %v669_v1  ;;  %v674_v3 = vsel %vm670_vm1, %v669_v1, %v663_v58 }
 0x223   :  { %v675_v4 = vmax.f32 %v658_v55, %v674_v3  ;;  %v678_v5 = vmax.f32 %v661_v52, %v671_v2  ;;  %v778_v52 = vld [vmem:[#allocation7 + $0x10] sm:$0xff]  ;;  %v777_v55 = vld [vmem:[#allocation7 + $0x8] sm:$0xff] }
 0x224   :  { %801 = vmatpush.msra.mxu0 %v778_v52 }
 0x225   :  { %v679_v7 = vmax.f32 %v675_v4, %v678_v5  ;;  %v680_v8 = vmax.f32 %v676_v63, %v675_v4  ;;  %v682_v9 = vmax.f32 %v678_v5, %v677_v0 }
 0x226   :  { %802 = vmatpush.msra.mxu0 %v777_v55 }
 0x227   :  { %v683_v10 = vmax.f32 %v679_v7, %v681_v6  ;;  %v684_v11 = vmax.f32 %v680_v8, %v682_v9 }
 0x228   :  { %803 = vmatpush.msra.mxu0 %v776_v57 }
 0x229   :  { %v685_v12 = vsub.f32 %v1018_v18, %v683_v10  ;;  %v686_v13 = vsub.f32 %v481_v25, %v684_v11  ;;  %v687_v14 = vsub.f32 %v561_v32, %v683_v10  ;;  %v688_v19 = vsub.f32 %v641_v39, %v684_v11 }
 0x22b   :  { %v689_v15 = vmul.f32 1.442695, %v685_v12  ;;  %v691_v16 = vmul.f32 1.442695, %v686_v13  ;;  %v693_v17 = vmul.f32 1.442695, %v687_v14 }
 0x22c   :  { %v695_v20 = vmul.f32 1.442695, %v688_v19 }
 0x22d   :  { %838 = vpow2.f32 %v689_v15 }
 0x22e   :  { %840 = vpow2.f32 %v691_v16 }
 0x22f   :  { %842 = vpow2.f32 %v693_v17 }
 0x230   :  { %844 = vpow2.f32 %v695_v20 }
 0x233   :  { %v839_v21 = vpop.eup %838 }
 0x234   :  { %v841_v22 = vpop.eup %840  ;;  %717 = vrot.lane.b32.xlu2 %v839_v21, %s952_s24  ;;  %v697_v24 = vmul.f32 %v839_v21, %v999_v53 }
 0x235   :  { %v843_v23 = vpop.eup %842  ;;  %719 = vrot.lane.b32.xlu0 %v841_v22, %s952_s24  ;;  %v698_v25 = vmul.f32 %v841_v22, %v1002_v54 }
 0x236   :  { %721 = vrot.lane.b32.xlu1 %v843_v23, %s952_s24  ;;  %v845_v18 = vpop.eup %844  ;;  %v699_v26 = vmul.f32 %v843_v23, %v994_v44 }
 0x237   :  { %v700_v27 = vmul.f32 %v845_v18, %v996_v48 }
 0x23c   :  { %723 = vrot.lane.b32.xlu2 %v845_v18, %s952_s24 }
 0x23d   :  { %701 = vrot.lane.b32.xlu0 %v697_v24, %s952_s24 }
 0x23e   :  { %703 = vrot.lane.b32.xlu1 %v698_v25, %s952_s24 }
 0x244   :  { %705 = vrot.lane.b32.xlu2 %v699_v26, %s952_s24 }
 0x245   :  { %707 = vrot.lane.b32.xlu0 %v700_v27, %s952_s24 }
 0x28e   :  { %v718_v28 = vpop.permute.xlu2 %717 }
 0x296   :  { %v724_v29 = vpop.permute.xlu2 %723 }
 0x297   :  { %v728_v53 = vsel %vm653_vm0, %v724_v29, %v718_v28 }
 0x298   :  { %v729_v54 = vadd.f32 %v839_v21, %v728_v53 }
 0x29a   :  { %749 = vrot.lane.b32.xlu1 %v729_v54, %s957_s0 }
 0x29e   :  { %v706_v37 = vpop.permute.xlu2 %705 }
 0x2a7   :  { %v720_v30 = vpop.permute.xlu0 %719 }
 0x2a8   :  { %v727_v31 = vsel %vm653_vm0, %v718_v28, %v720_v30  ;;  %v722_v32 = vpop.permute.xlu1 %721  ;;  %v837_v28 = vld [vmem:[%s1112_s3] ss:$0 sm:$0xff] }
 0x2a9   :  { %v730_v44 = vadd.f32 %v841_v22, %v727_v31  ;;  %v725_v48 = vsel %vm653_vm0, %v722_v32, %v724_v29  ;;  %v726_v33 = vsel %vm653_vm0, %v720_v30, %v722_v32 }
 0x2aa   :  { %v731_v34 = vadd.f32 %v843_v23, %v726_v33  ;;  %v732_v35 = vadd.f32 %v845_v18, %v725_v48 }
 0x2ab   :  { %751 = vrot.lane.b32.xlu2 %v730_v44, %s957_s0 }
 0x2ac   :  { %755 = vrot.lane.b32.xlu1 %v732_v35, %s957_s0  ;;  %753 = vrot.lane.b32.xlu0 %v731_v34, %s957_s0 }
 0x2af   :  { %v702_v36 = vpop.permute.xlu0 %701 }
 0x2b0   :  { %v704_v38 = vpop.permute.xlu1 %703 }
 0x2b1   :  { %v710_v39 = vsel %vm653_vm0, %v704_v38, %v706_v37  ;;  %v711_v40 = vsel %vm653_vm0, %v702_v36, %v704_v38 }
 0x2b2   :  { %v715_v41 = vadd.f32 %v710_v39, %v699_v26  ;;  %v714_v43 = vadd.f32 %v711_v40, %v698_v25 }
 0x2b4   :  { %737 = vrot.lane.b32.xlu1 %v715_v41, %s957_s0  ;;  %735 = vrot.lane.b32.xlu0 %v714_v43, %s957_s0 }
 0x2b7   :  { %v708_v45 = vpop.permute.xlu0 %707 }
 0x2b8   :  { %v712_v46 = vsel %vm653_vm0, %v708_v45, %v702_v36  ;;  %v709_v49 = vsel %vm653_vm0, %v706_v37, %v708_v45 }
 0x2b9   :  { %v713_v47 = vadd.f32 %v712_v46, %v697_v24  ;;  %v716_v50 = vadd.f32 %v709_v49, %v700_v27 }
 0x2bb   :  { %733 = vrot.lane.b32.xlu2 %v713_v47, %s957_s0 }
 0x2c3   :  { %739 = vrot.lane.b32.xlu2 %v716_v50, %s957_s0 }
 0x305   :  { %v752_v56 = vpop.permute.xlu2 %751 }
 0x30c   :  { %v750_v58 = vpop.permute.xlu1 %749 }
 0x30d   :  { %v759_v60 = vsel %vm670_vm1, %v750_v58, %v752_v56 }
 0x30e   :  { %v762_v2 = vadd.f32 %v759_v60, %v730_v44 }
 0x315   :  { %v734_v59 = vpop.permute.xlu2 %733 }
 0x31d   :  { %v740_v9 = vpop.permute.xlu2 %739 }
 0x31e   :  { %v756_v61 = vpop.permute.xlu1 %755  ;;  %v754_v62 = vpop.permute.xlu0 %753  ;;  %v744_v15 = vsel %vm670_vm1, %v740_v9, %v734_v59 }
 0x31f   :  { %v760_v63 = vsel %vm670_vm1, %v756_v61, %v750_v58  ;;  %v757_v0 = vsel %vm670_vm1, %v754_v62, %v756_v61  ;;  %v758_v1 = vsel %vm670_vm1, %v752_v56, %v754_v62  ;;  %v745_v20 = vadd.f32 %v744_v15, %v713_v47 }
 0x320   :  { %v761_v3 = vadd.f32 %v760_v63, %v729_v54  ;;  %v763_v4 = vadd.f32 %v758_v1, %v731_v34  ;;  %v764_v5 = vadd.f32 %v757_v0, %v732_v35 }
 0x322   :  { %v767_v6 = vadd.f32 %v764_v5, %v761_v3  ;;  %v768_v7 = vadd.f32 %v763_v4, %v762_v2 }
 0x324   :  { %v770_v8 = vadd.f32 %v768_v7, %v767_v6 }
 0x326   :  { %846 = vrcp.f32 %v770_v8  ;;  %v738_v10 = vpop.permute.xlu1 %737  ;;  %v736_v11 = vpop.permute.xlu0 %735 }
 0x327   :  { %v741_v12 = vsel %vm670_vm1, %v738_v10, %v740_v9  ;;  %v742_v13 = vsel %vm670_vm1, %v736_v11, %v738_v10  ;;  %v743_v14 = vsel %vm670_vm1, %v734_v59, %v736_v11 }
 0x328   :  { %v748_v16 = vadd.f32 %v741_v12, %v716_v50  ;;  %v746_v17 = vadd.f32 %v743_v14, %v714_v43  ;;  %v747_v19 = vadd.f32 %v742_v13, %v715_v41 }
 0x32a   :  { %v765_v23 = vadd.f32 %v748_v16, %v745_v20  ;;  %v766_v18 = vadd.f32 %v747_v19, %v746_v17 }
 0x32c   :  { %v847_v21 = vpop.eup %846  ;;  %v769_v26 = vadd.f32 %v766_v18, %v765_v23 }
 0x32d   :  { %v772_v22 = vmul.f32 %v847_v21, %v770_v8 }
 0x32f   :  { %v773_v24 = vsub.f32 2.0, %v772_v22 }
 0x331   :  { %v774_v25 = vmul.f32 %v847_v21, %v773_v24 }
 0x333   :  { %v775_v27 = vmul.f32 %v774_v25, %v769_v26 }
 0x335   :  { %827 = vmatmul.msk.f32.vlgmr.msra.gmra.mxu0 %vm784_vm2, %v775_v27 }
 0x3b2   :  { %v805_v42 = vpop.f32.mrf.mxu0 }
 0x3b3   :  { %v806_v29 = vadd.f32 %v837_v28, %v805_v42 }
 0x3b5   :  { %808 = vst [vmem:[#allocation8] sm:$0xff] %v806_v29 }
 0x3b6   :  { %819 = dma.vmem_to_hbm [thread:$0]  %s815_s9, 128, %s817_s12, [#allocation4]  }
 0x3b7   :  { %948 = dma.done.wait [#allocation4], 128  }
 0x3b8   :  { %949 = vsyncadd [#allocation4], 4294967168 }
 0x3b9   :  { %824 = vsyncpa [#allocation3], 1 }
 0x3ba   :  { %825 = vsyncpa [#allocation6], 1 }
 0x3bb   :  { %826 = vsyncpa [#allocation4], 1 }

</bundles_post_ra>
